<compile_context>
chip_gen: v6e
topology: v6e:2x2x1
jax: 0.10.0
libtpu: 0.0.40
codegen_flags: <defaults>
</compile_context>

<pallas_src>
import jax
import jax.numpy as jnp
from jax.experimental import pallas as pl
from jax.experimental.pallas import tpu as pltpu


def _round_up(n, m):
    return ((n + m - 1) // m) * m


def policy_kernel(x_ref, w1_ref, b1_ref, w2_ref, b2_ref, o_ref):
    # fc1: in-kernel f32->bf16 cast of x, MXU matmul, f32 accumulate, bias+ReLU.
    x = x_ref[...].astype(w1_ref.dtype)
    h = jnp.dot(x, w1_ref[...], preferred_element_type=jnp.float32)
    h = jnp.maximum(h + b1_ref[...], 0.0)

    # fc2: cast activations to the weight dtype for the MXU, accumulate in f32.
    logits = jnp.dot(h.astype(w2_ref.dtype), w2_ref[...],
                     preferred_element_type=jnp.float32)
    logits = logits + b2_ref[...]

    # Numerically-stable softmax over the last (9-wide) dim, all f32.
    # reciprocal-multiply instead of divide: the recip goes to the EUP slot.
    m = jnp.max(logits, axis=-1, keepdims=True)
    e = jnp.exp(logits - m)
    inv = pl.reciprocal(jnp.sum(e, axis=-1, keepdims=True), approx=True)
    o_ref[...] = (e * inv).astype(o_ref.dtype)


def policy_forward(x, w1, b1, w2, b2, *, tile_b=4096, use_bf16=True):
    """x: (B, input_size) f32; w1:(in,hidden), w2:(hidden,out); b1:(1,hidden),
    b2:(1,out).  Returns (B, output_size) f32 softmax probabilities."""
    B, K = x.shape
    H = w1.shape[1]
    O = w2.shape[1]

    op_dtype = jnp.bfloat16 if use_bf16 else jnp.float32
    align = 16 if use_bf16 else 8  # bf16 sublane packing is (16, 128)

    # --- batch tile selection -------------------------------------------------
    if B <= align:
        # Tiny batch: single block equal to the full array dims (always legal,
        # no padding, no raggedness).
        tb = B
    else:
        # Cap at (a) user tile, (b) half the batch rounded to 512 so a large
        # batch always produces >=2 grid tiles (v7x megacore sharding), and
        # (c) the aligned batch size itself.  Keep tb a multiple of the pack.
        two_tile = _round_up(pl.cdiv(B, 2), 512)
        tb = min(tile_b, two_tile, _round_up(B, align))
        tb = _round_up(max(tb, align), align)
    grid = (pl.cdiv(B, tb),)  # ragged last block is masked by Pallas (no jnp.pad)

    # Weights are tiny and resident: one-time bf16 cast in the wrapper is fine.
    w1q = w1.astype(op_dtype)
    w2q = w2.astype(op_dtype)

    weight_bytes = (w1q.size * w1q.dtype.itemsize + w2q.size * w2q.dtype.itemsize
                    + b1.size * b1.dtype.itemsize + b2.size * b2.dtype.itemsize)
    cost = pl.CostEstimate(
        flops=2 * B * (K * H + H * O),
        transcendentals=B * O,                         # exp in the softmax
        bytes_accessed=B * K * x.dtype.itemsize + B * O * 4 + weight_bytes,
    )

    # Weights/biases: constant index_map -> one DMA, resident across the grid.
    resident = lambda shape: pl.BlockSpec(shape, lambda i: (0, 0))

    out = pl.pallas_call(
        policy_kernel,
        out_shape=jax.ShapeDtypeStruct((B, O), jnp.float32),
        grid=grid,
        in_specs=[
            pl.BlockSpec((tb, K), lambda i: (i, 0)),   # x: walks the batch axis (f32)
            resident((K, H)),                          # W1 (bf16)
            resident((1, H)),                          # b1 (f32)
            resident((H, O)),                          # W2 (bf16)
            resident((1, O)),                          # b2 (f32)
        ],
        # O=9 (<128 lanes) -> masked stores; cheaper than 14x-ing the HBM
        # writeback by padding to 128 lanes in this mem-bound regime.
        out_specs=pl.BlockSpec((tb, O), lambda i: (i, 0)),
        compiler_params=pltpu.CompilerParams(
            # independent batch tiles -> shard across TensorCores (v7x megacore)
            dimension_semantics=("parallel",),
            # big tiles need more than the 16/32 MiB scoped defaults; 48 MiB is
            # safe on v5e/v6e (128 MiB physical) and under v7x's 64 MiB.
            vmem_limit_bytes=48 * 1024 * 1024,
        ),
        cost_estimate=cost,
    )(x, w1q, b1, w2q, b2)

    return out


def _reference(x, w1, b1, w2, b2, use_bf16=True):
    """Plain-JAX reference with matching (bf16-operand, f32-accumulate) math."""
    op = jnp.bfloat16 if use_bf16 else jnp.float32
    h = jnp.dot(x.astype(op), w1.astype(op),
                preferred_element_type=jnp.float32) + b1
    h = jnp.maximum(h, 0.0)
    logits = jnp.dot(h.astype(op), w2.astype(op),
                     preferred_element_type=jnp.float32) + b2
    return jax.nn.softmax(logits, axis=-1)


if __name__ == "__main__":
    input_size, hidden_size, output_size = 27, 256, 9

    key = jax.random.PRNGKey(0)
    k_x, k_x2, k_w1, k_b1, k_w2, k_b2 = jax.random.split(key, 6)

    # PyTorch-style uniform(-1/sqrt(fan_in), 1/sqrt(fan_in)) init.
    lim1 = 1.0 / jnp.sqrt(jnp.float32(input_size))
    lim2 = 1.0 / jnp.sqrt(jnp.float32(hidden_size))
    w1 = jax.random.uniform(k_w1, (input_size, hidden_size), jnp.float32, -lim1, lim1)
    b1 = jax.random.uniform(k_b1, (1, hidden_size), jnp.float32, -lim1, lim1)
    w2 = jax.random.uniform(k_w2, (hidden_size, output_size), jnp.float32, -lim2, lim2)
    b2 = jax.random.uniform(k_b2, (1, output_size), jnp.float32, -lim2, lim2)

    # --- small demo batch (B=2): single full-array block ----------------------
    batch = 2
    x = jax.random.uniform(k_x, (batch, input_size), jnp.float32)
    out = jax.block_until_ready(policy_forward(x, w1, b1, w2, b2))
    ref = _reference(x, w1, b1, w2, b2)
    assert out.shape == (batch, output_size)
    assert jnp.allclose(out, ref, atol=5e-3), "mismatch vs reference (B=2)"
    assert jnp.allclose(jnp.sum(out, axis=-1), 1.0, atol=5e-3)

    # --- batched path: exercises batch tiling + masked ragged last tile -------
    batch2 = 300
    x2 = jax.random.uniform(k_x2, (batch2, input_size), jnp.float32)
    out2 = jax.block_until_ready(policy_forward(x2, w1, b1, w2, b2, tile_b=128))
    ref2 = _reference(x2, w1, b1, w2, b2)
    assert out2.shape == (batch2, output_size)
    assert jnp.allclose(out2, ref2, atol=5e-3), "mismatch vs reference (B=300)"
    assert jnp.allclose(jnp.sum(out2, axis=-1), 1.0, atol=5e-3)

    print("KERNEL_OK")
</pallas_src>

<mosaic_0001>
module attributes {stable_mosaic.version = 11 : i64} {
  func.func @policy_kernel(%arg0: i32, %arg1: memref<2x27xf32, #tpu.memory_space<vmem>>, %arg2: memref<27x256xbf16, #tpu.memory_space<vmem>>, %arg3: memref<1x256xf32, #tpu.memory_space<vmem>>, %arg4: memref<256x9xbf16, #tpu.memory_space<vmem>>, %arg5: memref<1x9xf32, #tpu.memory_space<vmem>>, %arg6: memref<2x9xf32, #tpu.memory_space<vmem>>) attributes {dimension_semantics = [#tpu.dimension_semantics<parallel>], iteration_bounds = array<i64: 1>, scalar_prefetch = 0 : i64, scratch_operands = 0 : i64, tpu.core_type = #tpu.core_type<tc>, window_params = [{transform_indices = @transform_0, window_bounds = array<i64: 2, 27>}, {pipeline_mode = #tpu.pipeline_mode<synchronous>, transform_indices = @transform_1, window_bounds = array<i64: 27, 256>}, {pipeline_mode = #tpu.pipeline_mode<synchronous>, transform_indices = @transform_2, window_bounds = array<i64: 1, 256>}, {pipeline_mode = #tpu.pipeline_mode<synchronous>, transform_indices = @transform_3, window_bounds = array<i64: 256, 9>}, {pipeline_mode = #tpu.pipeline_mode<synchronous>, transform_indices = @transform_4, window_bounds = array<i64: 1, 9>}, {transform_indices = @transform_5, window_bounds = array<i64: 2, 9>}]} {
    %c0 = arith.constant 0 : index
    %c0_0 = arith.constant 0 : index
    %0 = vector.load %arg1[%c0, %c0_0] : memref<2x27xf32, #tpu.memory_space<vmem>>, vector<2x27xf32>
    %1 = arith.truncf %0 : vector<2x27xf32> to vector<2x27xbf16>
    %c0_1 = arith.constant 0 : index
    %c0_2 = arith.constant 0 : index
    %2 = vector.load %arg2[%c0_1, %c0_2] : memref<27x256xbf16, #tpu.memory_space<vmem>>, vector<27x256xbf16>
    %cst = arith.constant dense<0.000000e+00> : vector<2x256xf32>
    %3 = tpu.matmul %1, %2, %cst {dimension_numbers = #tpu.dot_dimension_numbers<[1], [0], [0], [1], [0, 0, 1, 1], [], []>} : vector<2x27xbf16>, vector<27x256xbf16>, vector<2x256xf32> -> vector<2x256xf32>
    %c0_3 = arith.constant 0 : index
    %c0_4 = arith.constant 0 : index
    %4 = vector.load %arg3[%c0_3, %c0_4] : memref<1x256xf32, #tpu.memory_space<vmem>>, vector<1x256xf32>
    %5 = vector.broadcast %4 : vector<1x256xf32> to vector<2x256xf32>
    %6 = arith.addf %3, %5 : vector<2x256xf32>
    %cst_5 = arith.constant 0.000000e+00 : f32
    %7 = vector.broadcast %cst_5 : f32 to vector<2x256xf32>
    %8 = arith.maximumf %6, %7 : vector<2x256xf32>
    %9 = arith.truncf %8 : vector<2x256xf32> to vector<2x256xbf16>
    %c0_6 = arith.constant 0 : index
    %c0_7 = arith.constant 0 : index
    %10 = vector.load %arg4[%c0_6, %c0_7] : memref<256x9xbf16, #tpu.memory_space<vmem>>, vector<256x9xbf16>
    %cst_8 = arith.constant dense<0.000000e+00> : vector<2x9xf32>
    %11 = tpu.matmul %9, %10, %cst_8 {dimension_numbers = #tpu.dot_dimension_numbers<[1], [0], [0], [1], [0, 0, 1, 1], [], []>} : vector<2x256xbf16>, vector<256x9xbf16>, vector<2x9xf32> -> vector<2x9xf32>
    %c0_9 = arith.constant 0 : index
    %c0_10 = arith.constant 0 : index
    %12 = vector.load %arg5[%c0_9, %c0_10] : memref<1x9xf32, #tpu.memory_space<vmem>>, vector<1x9xf32>
    %13 = vector.broadcast %12 : vector<1x9xf32> to vector<2x9xf32>
    %14 = arith.addf %11, %13 : vector<2x9xf32>
    %cst_11 = arith.constant dense<0xFF800000> : vector<2xf32>
    %15 = vector.multi_reduction <maximumf>, %14, %cst_11 [1] : vector<2x9xf32> to vector<2xf32>
    %16 = vector.shape_cast %15 : vector<2xf32> to vector<2x1xf32>
    %17 = vector.broadcast %16 : vector<2x1xf32> to vector<2x9xf32>
    %18 = arith.subf %14, %17 : vector<2x9xf32>
    %19 = math.exp %18 : vector<2x9xf32>
    %cst_12 = arith.constant dense<0.000000e+00> : vector<2xf32>
    %20 = vector.multi_reduction <add>, %19, %cst_12 [1] : vector<2x9xf32> to vector<2xf32>
    %21 = vector.shape_cast %20 : vector<2xf32> to vector<2x1xf32>
    %22 = tpu.reciprocal %21 {approx = true} : vector<2x1xf32> -> vector<2x1xf32>
    %23 = vector.broadcast %22 : vector<2x1xf32> to vector<2x9xf32>
    %24 = arith.mulf %19, %23 : vector<2x9xf32>
    %c0_13 = arith.constant 0 : index
    %c0_14 = arith.constant 0 : index
    %25 = vector.load %arg6[%c0_13, %c0_14] : memref<2x9xf32, #tpu.memory_space<vmem>>, vector<2x9xf32>
    tpu.vector_store %arg6[%c0_13, %c0_14], %24 {strides = array<i32>} : memref<2x9xf32, #tpu.memory_space<vmem>>, vector<2x9xf32>,
    return
  }
  func.func @transform_0(%arg0: i32) -> (i32, i32) {
    %c0_i32 = arith.constant 0 : i32
    %c0_i32_0 = arith.constant 0 : i32
    return %arg0, %c0_i32 : i32, i32
  }
  func.func @transform_1(%arg0: i32) -> (i32, i32) {
    %c0_i32 = arith.constant 0 : i32
    %c0_i32_0 = arith.constant 0 : i32
    %c0_i32_1 = arith.constant 0 : i32
    return %c0_i32, %c0_i32_0 : i32, i32
  }
  func.func @transform_2(%arg0: i32) -> (i32, i32) {
    %c0_i32 = arith.constant 0 : i32
    %c0_i32_0 = arith.constant 0 : i32
    %c0_i32_1 = arith.constant 0 : i32
    return %c0_i32, %c0_i32_0 : i32, i32
  }
  func.func @transform_3(%arg0: i32) -> (i32, i32) {
    %c0_i32 = arith.constant 0 : i32
    %c0_i32_0 = arith.constant 0 : i32
    %c0_i32_1 = arith.constant 0 : i32
    return %c0_i32, %c0_i32_0 : i32, i32
  }
  func.func @transform_4(%arg0: i32) -> (i32, i32) {
    %c0_i32 = arith.constant 0 : i32
    %c0_i32_0 = arith.constant 0 : i32
    %c0_i32_1 = arith.constant 0 : i32
    return %c0_i32, %c0_i32_0 : i32, i32
  }
  func.func @transform_5(%arg0: i32) -> (i32, i32) {
    %c0_i32 = arith.constant 0 : i32
    %c0_i32_0 = arith.constant 0 : i32
    return %arg0, %c0_i32 : i32, i32
  }
}

</mosaic_0001>

<bundles_post_ra>
// kernel: tpu_custom_call.1
= control target key start
LH: loop header
LB: loop body
LE: loop exit
PB: predicated region body
PF: predicated region fallthrough
CT: control target
= control target key end

     0   :  { %vm62_vm0 = vcmask 1044480   ;;  %vm63_vm1 = vcmask 1045504   ;;  %v414_v2 = vmov 65535   ;;  %v415_v6 = vmov 0   ;;  %s522_s0 = inlined_call_operand.vmem [shape: f32[2,27], index: 0, kind: input, shape index: {}]   ;;  %s523_s1 = inlined_call_operand.vmem [shape: bf16[27,256], index: 1, kind: input, shape index: {}]   ;;  %s524_s2 = inlined_call_operand.vmem [shape: f32[1,256], index: 2, kind: input, shape index: {}]   ;;  %s525_s3 = inlined_call_operand.vmem [shape: bf16[256,9], index: 3, kind: input, shape index: {}]   ;;  %s526_s4 = inlined_call_operand.vmem [shape: f32[1,9], index: 4, kind: input, shape index: {}]   ;;  %s527_s5 = inlined_call_operand.hbm [shape: f32[2,9], index: 5, kind: output, shape index: {}]  }
   0x1   :  { %v366_v0 = vld [vmem:[%s523_s1 + $0x14] ss:$8 sps:$4 sm:$0x3f]   ;;  %v368_v1 = vld [vmem:[%s523_s1 + $0x10] ss:$8 sps:$4 sm:$0x3f]   ;;  %104 = vmatprep.mubr.bf16.mxu0 %v415_v6 }
   0x2   :  { %v64_v3 = vsel %vm62_vm0, 4294967295, %v414_v2  ;;  %v369_v5 = vld [vmem:[%s523_s1 + $0x4] ss:$8 sps:$4 sm:$0xff]   ;;  %v372_v9 = vld [vmem:[%s525_s3 + $0x78] sm:$0xff]   ;;  %v371_v10 = vld [vmem:[%s523_s1] ss:$8 sps:$4 sm:$0xff]  }
   0x3   :  { %v65_v4 = vsel %vm63_vm1, %v64_v3, 0  ;;  %v22_v11 = vld [vmem:[%s522_s0] sm:$0x3]  ;;  %v373_v12 = vld [vmem:[%s525_s3 + $0x38] sm:$0xff]   ;;  %341 = vmatprep.subr.bf16.mxu1 %v372_v9  ;;  %v374_v13 = vld [vmem:[%s525_s3 + $0x70] sm:$0xff]   ;;  %vm58_vm2 = vcmask 220160  }
   0x4   :  { %v70_v7 = vand.u32 %v366_v0, %v65_v4  ;;  %v67_v8 = vand.u32 %v368_v1, %v65_v4  ;;  %342 = vmatpush3.bf16.msra.mxu1 %v373_v12  ;;  %v375_v14 = vld [vmem:[%s525_s3 + $0x30] sm:$0xff]   ;;  %v376_v15 = vld [vmem:[%s525_s3 + $0x68] sm:$0xff]   ;;  %v23_v16 = vpack.c.bf16 %v22_v11, %v22_v11  ;;  %v378_v18 = vld [vmem:[%s525_s3 + $0x60] sm:$0xff]  }
   0x5   :  { %343 = vmatprep.subr.bf16.mxu1 %v374_v13  ;;  %v377_v17 = vld [vmem:[%s525_s3 + $0x28] sm:$0xff]   ;;  %v379_v19 = vld [vmem:[%s525_s3 + $0x20] sm:$0xff]   ;;  %v380_v20 = vld [vmem:[%s525_s3 + $0x58] sm:$0xff]  }
   0x6   :  { %84 = vmatprep.subr.bf16.mxu0 %v70_v7  ;;  %v381_v21 = vld [vmem:[%s525_s3 + $0x18] sm:$0xff]  }
   0x7   :  { %85 = vmatpush1.bf16.msra.mxu0 %v67_v8 }
   0x8   :  { %86 = vmatprep.subr.bf16.mxu0 %v369_v5  ;;  %344 = vmatpush3.bf16.msra.mxu1 %v375_v14 }
   0x9   :  { %345 = vmatprep.subr.bf16.mxu1 %v376_v15 }
   0xb   :  { %87 = vmatpush1.bf16.msra.mxu0 %v371_v10 }
   0xc   :  { %346 = vmatpush3.bf16.msra.mxu1 %v377_v17 }
   0xd   :  { %347 = vmatprep.subr.bf16.mxu1 %v378_v18 }
   0xe   :  { %323 = vmatmul.mubr.msk.bf16.vlgmr.msra.gmra.mxu0 %vm58_vm2, %v23_v16 }
  0x10   :  { %348 = vmatpush3.bf16.msra.mxu1 %v379_v19 }
  0x11   :  { %10 = vsyncpa [#allocation3], 0  ;;  %349 = vmatprep.subr.bf16.mxu1 %v380_v20  ;;  %v382_v22 = vld [vmem:[%s525_s3 + $0x50] sm:$0xff]   ;;  %v384_v24 = vld [vmem:[%s525_s3 + $0x48] sm:$0xff]   ;;  %v30_v28 = vlaneseq  ;;  %vm292_vm3 = vcmask 66560  }
  0x12   :  { %v383_v23 = vld [vmem:[%s525_s3 + $0x10] sm:$0xff]   ;;  %v385_v25 = vld [vmem:[%s525_s3 + $0x8] sm:$0xff]   ;;  %v386_v26 = vld [vmem:[%s525_s3 + $0x40] sm:$0xff]  }
  0x13   :  { %v387_v27 = vld [vmem:[%s525_s3] sm:$0xff]   ;;  %v31_v29 = vshrl.u32 %v30_v28, 7 }
  0x14   :  { %350 = vmatpush3.bf16.msra.mxu1 %v381_v21  ;;  %v28_v31 = vld [vmem:[%s524_s2] sm:$0x3]  ;;  %s416_s2 = smov [#allocation2]  }
  0x15   :  { %351 = vmatprep.subr.bf16.mxu1 %v382_v22  ;;  %v32_v30 = vsub.s32 0, %v31_v29  ;;  %v36_v32 = vsub.s32 1, %v31_v29  ;;  %v324_v47 = vld [vmem:[%s526_s4] ss:$0 sm:$0xff]  ;;  %s311_s4 = sshll.u32 %s416_s2, 4  ;;  %s312_s4 = int_to_ptr.vmem [resolvable:$true] %s311_s4 }
  0x16   :  { %s392_s1 = scalar_lea.vmem %s312_s4, 32  ;;  %p397_p1 = scmp.lt.s32.totalorder %s312_s4, %s312_s4 }
  0x17   :  { %v33_v33 = vrot.slane %v28_v31, %v32_v30  ;;  %v37_v34 = vrot.slane %v28_v31, %v36_v32  ;;  %p393_p0 = scmp.ne.s32.totalorder %s312_s4, %s392_s1  ;;  %p398_p2 = scmp.lt.s32.totalorder %s392_s1, %s392_s1 }
  0x18   :  { %352 = vmatpush3.bf16.msra.mxu1 %v383_v23 }
  0x19   :  { %353 = vmatprep.subr.bf16.mxu1 %v384_v24  ;;  %p399_p3 = por %p398_p2, %p397_p1 }
  0x1b   :  { %p400_p4 = pnand %p399_p3, %p393_p0 }
  0x1c   :  { %354 = vmatpush3.bf16.msra.mxu1 %v385_v25 }
  0x1d   :  { %355 = vmatprep.subr.bf16.mxu1 %v386_v26 }
  0x20   :  { %356 = vmatpush3.bf16.msra.mxu1 %v387_v27 }
  0xce   :  { %v106_v35 = vpop.f32.mrf.mxu0 }
  0xcf   :  { %v107_v36 = vadd.f32 %v106_v35, %v33_v33 }
  0xd0   :  { %v108_v37 = vpop.f32.mrf.mxu0 }
  0xd1   :  { %v109_v38 = vadd.f32 %v108_v37, %v37_v34  ;;  %v113_v39 = vmax.f32 %v107_v36, 0.0 }
  0xd2   :  { %v110_v40 = vpop.f32.mrf.mxu0 }
  0xd3   :  { %v114_v41 = vmax.f32 %v109_v38, 0.0  ;;  %v115_v44 = vpack.c.bf16 %v113_v39, %v113_v39 }
  0xd4   :  { %v111_v42 = vpop.f32.mrf.mxu0 }
  0xd5   :  { %v116_v43 = vpack.c.bf16 %v114_v41, %v114_v41 }
  0xd7   :  { %284 = vmatprep.mubr.bf16.mxu1 %v116_v43 }
  0xd8   :  { %285 = vmatmul.mubr.bf16.vlgmr.msra.gmra.mxu1 %v115_v44 }
 0x198   :  { %v357_v45 = vpop.f32.mrf.mxu1 }
 0x19a   :  { %v358_v46 = vpop.f32.mrf.mxu1 }
 0x19b   :  { %v359_v48 = vadd.f32 %v358_v46, %v357_v45 }
 0x19c   :  { %v360_v49 = vpop.f32.mrf.mxu1 }
 0x19d   :  { %v287_v50 = vadd.f32 %v359_v48, %v324_v47 }
 0x19e   :  { %v361_v51 = vpop.f32.mrf.mxu1 }
 0x19f   :  { %v293_v52 = vsel %vm292_vm3, %v287_v50, -inf }
 0x1a0   :  { %294 = vmax.xlane.f32.xlu0 %v293_v52 }
 0x229   :  { %v295_v53 = vpop.xlane.xlu0 %294 }
 0x22a   :  { %v296_v54 = vsub.f32 %v287_v50, %v295_v53 }
 0x22c   :  { %v297_v55 = vmul.f32 1.442695, %v296_v54 }
 0x22e   :  { %388 = vpow2.f32 %v297_v55 }
 0x23b   :  { %v389_v56 = vpop.eup %388 }
 0x23c   :  { %v299_v57 = vsel %vm292_vm3, %v389_v56, 0.0 }
 0x23d   :  { %300 = vadd.xlane.f32.xlu0 %v299_v57 }
 0x2c6   :  { %v301_v58 = vpop.xlane.xlu0 %300 }
 0x2c7   :  { %390 = vrcp.f32 %v301_v58 }
 0x2d4   :  { %v391_v59 = vpop.eup %390 }
 0x2d5   :  { %v303_v60 = vmul.f32 %v391_v59, %v389_v56 }
 0x2d7   :  { %304 = vst.msk [vmem:[#allocation2] sm:$0x3] %vm292_vm3, %v303_v60 }
 0x2d8   :  { %403 = shalt.err (!%p400_p4)
}
 0x2d9   :  { %314 = dma.vmem_to_hbm [thread:$0]  %s312_s4, 32, %s527_s5, [#allocation3]  }
 0x2da   :  { %412 = dma.done.wait [#allocation3], 32  }
 0x2db   :  { %413 = vsyncadd [#allocation3], 4294967264 }
 0x2dc   :  { %318 = vsyncpa [#allocation3], 1 }

</bundles_post_ra>
